<compile_context>
chip_gen: v5e
topology: v5e:2x2
jax: 0.10.0
libtpu: 0.0.40
codegen_flags: <defaults>
</compile_context>

<pallas_src>
import functools

import jax
import jax.numpy as jnp
from jax import lax
from jax.experimental import pallas as pl
from jax.experimental.pallas import tpu as pltpu


# ----------------------------------------------------------------------------
# Kernel body: one image per grid step, lane-dense (C, P) activations.
# ----------------------------------------------------------------------------
def _fused_body(enc_ref,      # (C, P)            raw encoder features (f32)
                dec_ref,      # (C, hin, win)     raw decoder features (f32)
                masks_ref,    # (4, P)            [row>=1, row<=H-2, col>=1, col<=W-2] (f32 0/1)
                w1e_ref,      # (C, C)  1x1 conv weight, enc half (BN folded, mxu_dtype)
                w1d_ref,      # (C, C)  1x1 conv weight, dec half (BN folded, mxu_dtype)
                b1_ref,       # (C, 1)  f32
                w2_ref,       # (9, C, C) 3x3 conv weight per tap (BN folded, mxu_dtype)
                b2_ref,       # (C, 1)  f32
                rh_ref,       # (H, hin) height bilinear factor (mxu_dtype) or None
                rwt_ref,      # (win, W) width bilinear factor (mxu_dtype) or None
                o_ref,        # (C, P)  f32
                *, H, W, eps, mxu_dtype):
    C, P = enc_ref.shape

    def mm(a, b):
        # MXU matmuls in mxu_dtype (default bf16), f32 accumulation.
        return jnp.dot(a.astype(mxu_dtype), b.astype(mxu_dtype),
                       preferred_element_type=jnp.float32)

    # --- enc_fea_proc: InstanceNorm2d (per-image stats, no affine) + ReLU ----
    enc = enc_ref[...]                                     # (C, P) f32
    mu = jnp.mean(enc, axis=-1, keepdims=True)
    cen = enc - mu
    var = jnp.mean(cen * cen, axis=-1, keepdims=True)
    enc_n = jnp.maximum(cen * lax.rsqrt(var + eps), 0.0)   # (C, P)

    # --- bilinear align_corners upsample of dec: separable, two small matmuls
    if rh_ref is not None:
        dec = dec_ref[...]                                 # (C, hin, win)
        hin, win = dec.shape[1], dec.shape[2]
        # width interp: (C*hin, win) @ (win, W)
        t = mm(dec.reshape(C * hin, win), rwt_ref[...])    # (C*hin, W) f32
        # height interp: batched over channels, (C,H,hin) @ (C,hin,W)
        rh_b = jnp.broadcast_to(rh_ref[...], (C, H, hin))
        dec_up = jnp.einsum('cyh,chx->cyx', rh_b,
                            t.reshape(C, hin, W).astype(mxu_dtype),
                            preferred_element_type=jnp.float32)   # (C, H, W)
        dec_up = dec_up.reshape(C, H * W)
    else:
        # decoder already matches encoder size: no interp matmul at all.
        dec_up = dec_ref[...].reshape(C, H * W)

    # --- self.conv[0:3]: 1x1 (2C -> C) + BN + ReLU ----------------------------
    # channel concat of [enc, dec] replaced by a split weight + summed matmuls.
    h = mm(w1e_ref[...], enc_n) + mm(w1d_ref[...], dec_up)
    h = jnp.maximum(h + b1_ref[...], 0.0)                  # (C, P) f32

    # --- self.conv[3:6]: 3x3 pad=1 (C -> C) + BN + ReLU -----------------------
    # Per-tap matmul accumulation; masks precomputed in the wrapper; the two
    # row shifts (+/-W) are done once, column taps are +/-1 lane rolls of them.
    rm_up = masks_ref[0:1, :]      # neighbor row-1 valid
    rm_dn = masks_ref[1:2, :]      # neighbor row+1 valid
    cm_l = masks_ref[2:3, :]       # neighbor col-1 valid
    cm_r = masks_ref[3:4, :]       # neighbor col+1 valid

    def tap(t_idx, x):             # tap index t = (kh*3 + kw), kh/kw in {0,1,2}
        return mm(w2_ref[t_idx], x)

    y = tap(4, h)                                                      # ( 0, 0)
    y += tap(3, pltpu.roll(h, shift=1, axis=1) * cm_l)                 # ( 0,-1)
    y += tap(5, pltpu.roll(h, shift=P - 1, axis=1) * cm_r)             # ( 0,+1)
    up_row = pltpu.roll(h, shift=W, axis=1) * rm_up                    # row - 1 base
    y += tap(1, up_row)                                                # (-1, 0)
    y += tap(0, pltpu.roll(up_row, shift=1, axis=1) * cm_l)            # (-1,-1)
    y += tap(2, pltpu.roll(up_row, shift=P - 1, axis=1) * cm_r)        # (-1,+1)
    dn_row = pltpu.roll(h, shift=P - W, axis=1) * rm_dn                # row + 1 base
    y += tap(7, dn_row)                                                # (+1, 0)
    y += tap(6, pltpu.roll(dn_row, shift=1, axis=1) * cm_l)            # (+1,-1)
    y += tap(8, pltpu.roll(dn_row, shift=P - 1, axis=1) * cm_r)        # (+1,+1)

    y = jnp.maximum(y + b2_ref[...], 0.0)

    # TODO(synk): DualGCNHead (self.gcn) is not defined in the provided source;
    # the kernel returns the fused `self.conv` features instead.
    o_ref[...] = y.astype(o_ref.dtype)


def _make_kernel(H, W, eps, upsample, mxu_dtype):
    body = functools.partial(_fused_body, H=H, W=W, eps=eps, mxu_dtype=mxu_dtype)
    if upsample:
        def kernel(enc, dec, masks, w1e, w1d, b1, w2, b2, rh, rwt, o):
            body(enc, dec, masks, w1e, w1d, b1, w2, b2, rh, rwt, o)
    else:
        def kernel(enc, dec, masks, w1e, w1d, b1, w2, b2, o):
            body(enc, dec, masks, w1e, w1d, b1, w2, b2, None, None, o)
    return kernel


# ----------------------------------------------------------------------------
# 1-D align_corners bilinear interpolation factor (out_size, in_size).
# ----------------------------------------------------------------------------
def _interp_matrix(out_size, in_size):
    if out_size == in_size:
        return jnp.eye(out_size, dtype=jnp.float32)
    if out_size == 1 or in_size == 1:
        src = jnp.zeros((out_size,), jnp.float32)
    else:
        src = jnp.arange(out_size, dtype=jnp.float32) * ((in_size - 1) / (out_size - 1))
    i0 = jnp.clip(jnp.floor(src).astype(jnp.int32), 0, in_size - 1)
    i1 = jnp.minimum(i0 + 1, in_size - 1)
    frac = src - i0.astype(jnp.float32)
    eye = jnp.eye(in_size, dtype=jnp.float32)
    return eye[i0] * (1.0 - frac)[:, None] + eye[i1] * frac[:, None]


# ----------------------------------------------------------------------------
# Wrapper: NCHW in/out, grid over the batch, zero activation transposes.
# ----------------------------------------------------------------------------
def encdec_fusing_pallas(enc_nchw, dec_nchw, kparams, *,
                         eps=1e-5, mxu_dtype=jnp.bfloat16):
    N, C, H, W = enc_nchw.shape
    hin, win = dec_nchw.shape[2:]
    P = H * W

    # Mirror PyTorch: upsample only when the heights differ.
    needs_up = (hin != H)
    if not needs_up and win != W:
        raise ValueError("widths must match when heights match (as in the PyTorch module)")

    # No transposes: (N, C, H*W) / (N, C, hin, win) are plain reshapes of NCHW.
    enc_k = enc_nchw.reshape(N, C, P).astype(jnp.float32)
    dec_k = dec_nchw.astype(jnp.float32)

    # Hoisted, data-independent 3x3 boundary masks (shared by every image).
    pix = jnp.arange(P, dtype=jnp.int32)
    row, col = pix // W, pix % W
    masks = jnp.stack([row >= 1, row <= H - 2,
                       col >= 1, col <= W - 2]).astype(jnp.float32)       # (4, P)

    # Weights pre-cast to the MXU dtype (bf16 by default); biases stay f32.
    w1e = kparams['w1e'].astype(mxu_dtype)
    w1d = kparams['w1d'].astype(mxu_dtype)
    w2t = kparams['w2t'].astype(mxu_dtype)
    b1 = kparams['b1'].astype(jnp.float32)
    b2 = kparams['b2'].astype(jnp.float32)

    inputs = [enc_k, dec_k, masks, w1e, w1d, b1, w2t, b2]
    in_specs = [
        pl.BlockSpec((None, C, P), lambda n: (n, 0, 0)),               # enc, per image
        pl.BlockSpec((None, C, hin, win), lambda n: (n, 0, 0, 0)),     # dec, per image
        pl.BlockSpec((4, P), lambda n: (0, 0)),                        # masks (fetched once)
        pl.BlockSpec((C, C), lambda n: (0, 0)),                        # w1e
        pl.BlockSpec((C, C), lambda n: (0, 0)),                        # w1d
        pl.BlockSpec((C, 1), lambda n: (0, 0)),                        # b1
        pl.BlockSpec((9, C, C), lambda n: (0, 0, 0)),                  # w2 (per tap)
        pl.BlockSpec((C, 1), lambda n: (0, 0)),                        # b2
    ]
    if needs_up:
        rh = _interp_matrix(H, hin).astype(mxu_dtype)                  # (H, hin)
        rwt = _interp_matrix(W, win).T.astype(mxu_dtype)               # (win, W)
        inputs += [rh, rwt]
        in_specs += [pl.BlockSpec((H, hin), lambda n: (0, 0)),
                     pl.BlockSpec((win, W), lambda n: (0, 0))]

    kern = _make_kernel(H, W, eps, needs_up, mxu_dtype)

    # TODO(synk): if N*H*W is not a multiple of 128, pad the lane dim (and the
    # masks) in the wrapper so every store is an unmasked full-lane vst.
    out = pl.pallas_call(
        kern,
        grid=(N,),
        in_specs=in_specs,
        out_specs=pl.BlockSpec((None, C, P), lambda n: (n, 0, 0)),
        out_shape=jax.ShapeDtypeStruct((N, C, P), jnp.float32),
        compiler_params=pltpu.CompilerParams(
            dimension_semantics=("parallel",),          # images across cores (v7x)
            vmem_limit_bytes=32 * 1024 * 1024),         # above v5e's 16 MiB default
    )(*inputs)

    return out.reshape(N, C, H, W)


# ----------------------------------------------------------------------------
# Deterministic parameters: Conv2d(bias) + BatchNorm2d(eval) folded together.
# ----------------------------------------------------------------------------
def _conv_bn_folded(key, cin, cout, k, eps=1e-5):
    k1, k2, k3, k4, k5, k6 = jax.random.split(key, 6)
    w = 0.2 * jax.random.normal(k1, (cout, cin, k, k), jnp.float32)   # OIHW
    b = 0.1 * jax.random.normal(k2, (cout,), jnp.float32)
    gamma = 1.0 + 0.1 * jax.random.normal(k3, (cout,), jnp.float32)
    beta = 0.1 * jax.random.normal(k4, (cout,), jnp.float32)
    mean = 0.1 * jax.random.normal(k5, (cout,), jnp.float32)
    var = 1.0 + 0.1 * jax.random.uniform(k6, (cout,), jnp.float32)
    scale = gamma / jnp.sqrt(var + eps)
    return w * scale[:, None, None, None], (b - mean) * scale + beta


def init_params(key, C):
    k1, k2 = jax.random.split(key)
    folded = {}
    folded['w1'], folded['b1'] = _conv_bn_folded(k1, 2 * C, C, 1)     # 1x1, 2C -> C
    folded['w2'], folded['b2'] = _conv_bn_folded(k2, C, C, 3)         # 3x3, C -> C

    kparams = {
        # split the 1x1 weight so the enc/dec concat never materializes
        'w1e': folded['w1'][:, :C, 0, 0],                             # (C, C)
        'w1d': folded['w1'][:, C:, 0, 0],                             # (C, C)
        'b1': folded['b1'].reshape(C, 1),
        # per-tap 3x3 weights: w2t[t] = w2[:, :, kh, kw], t = kh*3 + kw
        'w2t': jnp.stack([folded['w2'][:, :, kh, kw]
                          for kh in range(3) for kw in range(3)], axis=0),   # (9, C, C)
        'b2': folded['b2'].reshape(C, 1),
    }
    return folded, kparams


# ----------------------------------------------------------------------------
# Pure-JAX reference (mirrors the PyTorch eval forward) for correctness check.
# ----------------------------------------------------------------------------
def _bilinear_upsample_align_corners(x, h_out, w_out):
    _, _, h_in, w_in = x.shape

    def src(out_size, in_size):
        if out_size == 1 or in_size == 1:
            return jnp.zeros((out_size,), jnp.float32)
        return jnp.arange(out_size, dtype=jnp.float32) * ((in_size - 1) / (out_size - 1))

    sy, sx = src(h_out, h_in), src(w_out, w_in)
    y0 = jnp.clip(jnp.floor(sy).astype(jnp.int32), 0, h_in - 1)
    x0 = jnp.clip(jnp.floor(sx).astype(jnp.int32), 0, w_in - 1)
    y1 = jnp.minimum(y0 + 1, h_in - 1)
    x1 = jnp.minimum(x0 + 1, w_in - 1)
    fy = (sy - y0.astype(jnp.float32))[None, None, :, None]
    fx = (sx - x0.astype(jnp.float32))[None, None, None, :]
    v = x[:, :, y0, :] * (1.0 - fy) + x[:, :, y1, :] * fy
    return v[:, :, :, x0] * (1.0 - fx) + v[:, :, :, x1] * fx


def reference_forward(enc, dec, folded, eps=1e-5):
    mu = jnp.mean(enc, axis=(2, 3), keepdims=True)
    var = jnp.mean((enc - mu) ** 2, axis=(2, 3), keepdims=True)
    enc = jnp.maximum((enc - mu) / jnp.sqrt(var + eps), 0.0)

    if dec.shape[2:] != enc.shape[2:]:
        dec = _bilinear_upsample_align_corners(dec, enc.shape[2], enc.shape[3])

    x = jnp.concatenate([enc, dec], axis=1)

    def conv_block(h, w, b, pad):
        y = lax.conv_general_dilated(
            h, w, window_strides=(1, 1), padding=[(pad, pad), (pad, pad)],
            dimension_numbers=('NCHW', 'OIHW', 'NCHW'),
            precision=lax.Precision.HIGHEST)
        return jnp.maximum(y + b[None, :, None, None], 0.0)

    x = conv_block(x, folded['w1'], folded['b1'], pad=0)
    x = conv_block(x, folded['w2'], folded['b2'], pad=1)
    return x   # DualGCNHead omitted (class not provided in the spec)


if __name__ == "__main__":
    key = jax.random.PRNGKey(0)
    k_enc, k_dec, k_dec2, k_par = jax.random.split(key, 4)

    N, C, H, W = 2, 4, 16, 16          # encoder features
    hd, wd = 8, 8                      # decoder features (exercises the upsample path)
    enc = jax.random.normal(k_enc, (N, C, H, W), jnp.float32)
    dec = jax.random.normal(k_dec, (N, C, hd, wd), jnp.float32)
    dec_same = jax.random.normal(k_dec2, (N, C, H, W), jnp.float32)

    folded, kparams = init_params(k_par, C)

    # 1) f32 MXU path: tight check proves the fused math is exact.
    out_f32 = jax.block_until_ready(
        encdec_fusing_pallas(enc, dec, kparams, mxu_dtype=jnp.float32))
    ref = jax.block_until_ready(reference_forward(enc, dec, folded))
    assert out_f32.shape == (N, C, H, W), out_f32.shape
    err_f32 = float(jnp.max(jnp.abs(out_f32 - ref)))
    assert jnp.allclose(out_f32, ref, rtol=1e-3, atol=1e-3), err_f32

    # 2) default bf16 MXU path: looser, scale-relative check (bf16 operand
    #    rounding with f32 accumulation -- expected precision behavior).
    out_bf16 = jax.block_until_ready(encdec_fusing_pallas(enc, dec, kparams))
    rel_bf16 = float(jnp.max(jnp.abs(out_bf16 - ref)) / jnp.max(jnp.abs(ref)))
    assert rel_bf16 < 5e-2, rel_bf16

    # 3) equal-size decoder: upsample is skipped entirely (no identity matmul).
    out_same = jax.block_until_ready(encdec_fusing_pallas(enc, dec_same, kparams))
    ref_same = jax.block_until_ready(reference_forward(enc, dec_same, folded))
    rel_same = float(jnp.max(jnp.abs(out_same - ref_same)) / jnp.max(jnp.abs(ref_same)))
    assert rel_same < 5e-2, rel_same

    print("KERNEL_OK")
</pallas_src>

<mosaic_0001>
module attributes {stable_mosaic.version = 11 : i64} {
  func.func @kernel(%arg0: i32, %arg1: memref<1x4x256xf32, #tpu.memory_space<vmem>>, %arg2: memref<1x4x8x8xf32, #tpu.memory_space<vmem>>, %arg3: memref<4x256xf32, #tpu.memory_space<vmem>>, %arg4: memref<4x4xf32, #tpu.memory_space<vmem>>, %arg5: memref<4x4xf32, #tpu.memory_space<vmem>>, %arg6: memref<4x1xf32, #tpu.memory_space<vmem>>, %arg7: memref<9x4x4xf32, #tpu.memory_space<vmem>>, %arg8: memref<4x1xf32, #tpu.memory_space<vmem>>, %arg9: memref<16x8xf32, #tpu.memory_space<vmem>>, %arg10: memref<8x16xf32, #tpu.memory_space<vmem>>, %arg11: memref<1x4x256xf32, #tpu.memory_space<vmem>>) attributes {dimension_semantics = [#tpu.dimension_semantics<parallel>], iteration_bounds = array<i64: 2>, scalar_prefetch = 0 : i64, scratch_operands = 0 : i64, tpu.core_type = #tpu.core_type<tc>, window_params = [{transform_indices = @transform_0, window_bounds = array<i64: 1, 4, 256>}, {transform_indices = @transform_1, window_bounds = array<i64: 1, 4, 8, 8>}, {pipeline_mode = #tpu.pipeline_mode<synchronous>, transform_indices = @transform_2, window_bounds = array<i64: 4, 256>}, {pipeline_mode = #tpu.pipeline_mode<synchronous>, transform_indices = @transform_3, window_bounds = array<i64: 4, 4>}, {pipeline_mode = #tpu.pipeline_mode<synchronous>, transform_indices = @transform_4, window_bounds = array<i64: 4, 4>}, {pipeline_mode = #tpu.pipeline_mode<synchronous>, transform_indices = @transform_5, window_bounds = array<i64: 4, 1>}, {pipeline_mode = #tpu.pipeline_mode<synchronous>, transform_indices = @transform_6, window_bounds = array<i64: 9, 4, 4>}, {pipeline_mode = #tpu.pipeline_mode<synchronous>, transform_indices = @transform_7, window_bounds = array<i64: 4, 1>}, {pipeline_mode = #tpu.pipeline_mode<synchronous>, transform_indices = @transform_8, window_bounds = array<i64: 16, 8>}, {pipeline_mode = #tpu.pipeline_mode<synchronous>, transform_indices = @transform_9, window_bounds = array<i64: 8, 16>}, {transform_indices = @transform_10, window_bounds = array<i64: 1, 4, 256>}]} {
    %c0 = arith.constant 0 : index
    %c0_0 = arith.constant 0 : index
    %c0_1 = arith.constant 0 : index
    %0 = vector.load %arg1[%c0, %c0_0, %c0_1] : memref<1x4x256xf32, #tpu.memory_space<vmem>>, vector<1x4x256xf32>
    %1 = vector.shape_cast %0 : vector<1x4x256xf32> to vector<4x256xf32>
    %cst = arith.constant dense<0.000000e+00> : vector<4xf32>
    %2 = vector.multi_reduction <add>, %1, %cst [1] : vector<4x256xf32> to vector<4xf32>
    %3 = vector.shape_cast %2 : vector<4xf32> to vector<4x1xf32>
    %cst_2 = arith.constant 2.560000e+02 : f32
    %4 = vector.broadcast %cst_2 : f32 to vector<4x1xf32>
    %5 = arith.divf %3, %4 : vector<4x1xf32>
    %6 = vector.broadcast %5 : vector<4x1xf32> to vector<4x256xf32>
    %7 = arith.subf %1, %6 : vector<4x256xf32>
    %8 = arith.mulf %7, %7 : vector<4x256xf32>
    %cst_3 = arith.constant dense<0.000000e+00> : vector<4xf32>
    %9 = vector.multi_reduction <add>, %8, %cst_3 [1] : vector<4x256xf32> to vector<4xf32>
    %10 = vector.shape_cast %9 : vector<4xf32> to vector<4x1xf32>
    %cst_4 = arith.constant 2.560000e+02 : f32
    %11 = vector.broadcast %cst_4 : f32 to vector<4x1xf32>
    %12 = arith.divf %10, %11 : vector<4x1xf32>
    %cst_5 = arith.constant 9.99999974E-6 : f32
    %13 = vector.broadcast %cst_5 : f32 to vector<4x1xf32>
    %14 = arith.addf %12, %13 : vector<4x1xf32>
    %15 = math.rsqrt %14 : vector<4x1xf32>
    %16 = vector.broadcast %15 : vector<4x1xf32> to vector<4x256xf32>
    %17 = arith.mulf %7, %16 : vector<4x256xf32>
    %cst_6 = arith.constant 0.000000e+00 : f32
    %18 = vector.broadcast %cst_6 : f32 to vector<4x256xf32>
    %19 = arith.maximumf %17, %18 : vector<4x256xf32>
    %c0_7 = arith.constant 0 : index
    %c0_8 = arith.constant 0 : index
    %c0_9 = arith.constant 0 : index
    %c0_10 = arith.constant 0 : index
    %20 = vector.load %arg2[%c0_7, %c0_8, %c0_9, %c0_10] : memref<1x4x8x8xf32, #tpu.memory_space<vmem>>, vector<1x4x8x8xf32>
    %21 = vector.shape_cast %20 : vector<1x4x8x8xf32> to vector<4x8x8xf32>
    %22 = vector.shape_cast %21 : vector<4x8x8xf32> to vector<32x8xf32>
    %c0_11 = arith.constant 0 : index
    %c0_12 = arith.constant 0 : index
    %23 = vector.load %arg10[%c0_11, %c0_12] : memref<8x16xf32, #tpu.memory_space<vmem>>, vector<8x16xf32>
    %cst_13 = arith.constant dense<0.000000e+00> : vector<32x16xf32>
    %24 = tpu.matmul %22, %23, %cst_13 {dimension_numbers = #tpu.dot_dimension_numbers<[1], [0], [0], [1], [0, 0, 1, 1], [], []>} : vector<32x8xf32>, vector<8x16xf32>, vector<32x16xf32> -> vector<32x16xf32>
    %c0_14 = arith.constant 0 : index
    %c0_15 = arith.constant 0 : index
    %25 = vector.load %arg9[%c0_14, %c0_15] : memref<16x8xf32, #tpu.memory_space<vmem>>, vector<16x8xf32>
    %26 = vector.shape_cast %25 : vector<16x8xf32> to vector<1x16x8xf32>
    %27 = vector.broadcast %26 : vector<1x16x8xf32> to vector<4x16x8xf32>
    %28 = vector.shape_cast %24 : vector<32x16xf32> to vector<4x8x16xf32>
    "tpu.trace_start"() <{level = 10 : i32, message = "cyh,chx->cyx"}> : () -> ()
    %cst_16 = arith.constant dense<0.000000e+00> : vector<4x16x16xf32>
    %29 = tpu.matmul %27, %28, %cst_16 {dimension_numbers = #tpu.dot_dimension_numbers<[2], [1], [1], [2], [0, 0, 0, 1, 1, 2], [0], [0]>} : vector<4x16x8xf32>, vector<4x8x16xf32>, vector<4x16x16xf32> -> vector<4x16x16xf32>
    "tpu.trace_stop"() : () -> ()
    %30 = vector.shape_cast %29 : vector<4x16x16xf32> to vector<4x256xf32>
    %c0_17 = arith.constant 0 : index
    %c0_18 = arith.constant 0 : index
    %31 = vector.load %arg4[%c0_17, %c0_18] : memref<4x4xf32, #tpu.memory_space<vmem>>, vector<4x4xf32>
    %cst_19 = arith.constant dense<0.000000e+00> : vector<4x256xf32>
    %32 = tpu.matmul %31, %19, %cst_19 {dimension_numbers = #tpu.dot_dimension_numbers<[1], [0], [0], [1], [0, 0, 1, 1], [], []>} : vector<4x4xf32>, vector<4x256xf32>, vector<4x256xf32> -> vector<4x256xf32>
    %c0_20 = arith.constant 0 : index
    %c0_21 = arith.constant 0 : index
    %33 = vector.load %arg5[%c0_20, %c0_21] : memref<4x4xf32, #tpu.memory_space<vmem>>, vector<4x4xf32>
    %cst_22 = arith.constant dense<0.000000e+00> : vector<4x256xf32>
    %34 = tpu.matmul %33, %30, %cst_22 {dimension_numbers = #tpu.dot_dimension_numbers<[1], [0], [0], [1], [0, 0, 1, 1], [], []>} : vector<4x4xf32>, vector<4x256xf32>, vector<4x256xf32> -> vector<4x256xf32>
    %35 = arith.addf %32, %34 : vector<4x256xf32>
    %c0_23 = arith.constant 0 : index
    %c0_24 = arith.constant 0 : index
    %36 = vector.load %arg6[%c0_23, %c0_24] : memref<4x1xf32, #tpu.memory_space<vmem>>, vector<4x1xf32>
    %37 = vector.broadcast %36 : vector<4x1xf32> to vector<4x256xf32>
    %38 = arith.addf %35, %37 : vector<4x256xf32>
    %cst_25 = arith.constant 0.000000e+00 : f32
    %39 = vector.broadcast %cst_25 : f32 to vector<4x256xf32>
    %40 = arith.maximumf %38, %39 : vector<4x256xf32>
    %c0_26 = arith.constant 0 : index
    %c0_27 = arith.constant 0 : index
    %41 = vector.load %arg3[%c0_26, %c0_27] : memref<4x256xf32, #tpu.memory_space<vmem>>, vector<1x256xf32>
    %c1 = arith.constant 1 : index
    %c0_28 = arith.constant 0 : index
    %42 = vector.load %arg3[%c1, %c0_28] : memref<4x256xf32, #tpu.memory_space<vmem>>, vector<1x256xf32>
    %c2 = arith.constant 2 : index
    %c0_29 = arith.constant 0 : index
    %43 = vector.load %arg3[%c2, %c0_29] : memref<4x256xf32, #tpu.memory_space<vmem>>, vector<1x256xf32>
    %c3 = arith.constant 3 : index
    %c0_30 = arith.constant 0 : index
    %44 = vector.load %arg3[%c3, %c0_30] : memref<4x256xf32, #tpu.memory_space<vmem>>, vector<1x256xf32>
    %c4 = arith.constant 4 : index
    %c0_31 = arith.constant 0 : index
    %c0_32 = arith.constant 0 : index
    %45 = vector.load %arg7[%c4, %c0_31, %c0_32] : memref<9x4x4xf32, #tpu.memory_space<vmem>>, vector<1x4x4xf32>
    %46 = vector.shape_cast %45 : vector<1x4x4xf32> to vector<4x4xf32>
    %cst_33 = arith.constant dense<0.000000e+00> : vector<4x256xf32>
    %47 = tpu.matmul %46, %40, %cst_33 {dimension_numbers = #tpu.dot_dimension_numbers<[1], [0], [0], [1], [0, 0, 1, 1], [], []>} : vector<4x4xf32>, vector<4x256xf32>, vector<4x256xf32> -> vector<4x256xf32>
    %c1_i32 = arith.constant 1 : i32
    %48 = tpu.dynamic_rotate %40 by %c1_i32 dim 1 : vector<4x256xf32>, i32 -> vector<4x256xf32>
    %49 = vector.broadcast %43 : vector<1x256xf32> to vector<4x256xf32>
    %50 = arith.mulf %48, %49 : vector<4x256xf32>
    %c3_34 = arith.constant 3 : index
    %c0_35 = arith.constant 0 : index
    %c0_36 = arith.constant 0 : index
    %51 = vector.load %arg7[%c3_34, %c0_35, %c0_36] : memref<9x4x4xf32, #tpu.memory_space<vmem>>, vector<1x4x4xf32>
    %52 = vector.shape_cast %51 : vector<1x4x4xf32> to vector<4x4xf32>
    %cst_37 = arith.constant dense<0.000000e+00> : vector<4x256xf32>
    %53 = tpu.matmul %52, %50, %cst_37 {dimension_numbers = #tpu.dot_dimension_numbers<[1], [0], [0], [1], [0, 0, 1, 1], [], []>} : vector<4x4xf32>, vector<4x256xf32>, vector<4x256xf32> -> vector<4x256xf32>
    %54 = arith.addf %47, %53 : vector<4x256xf32>
    %c255_i32 = arith.constant 255 : i32
    %55 = tpu.dynamic_rotate %40 by %c255_i32 dim 1 : vector<4x256xf32>, i32 -> vector<4x256xf32>
    %56 = vector.broadcast %44 : vector<1x256xf32> to vector<4x256xf32>
    %57 = arith.mulf %55, %56 : vector<4x256xf32>
    %c5 = arith.constant 5 : index
    %c0_38 = arith.constant 0 : index
    %c0_39 = arith.constant 0 : index
    %58 = vector.load %arg7[%c5, %c0_38, %c0_39] : memref<9x4x4xf32, #tpu.memory_space<vmem>>, vector<1x4x4xf32>
    %59 = vector.shape_cast %58 : vector<1x4x4xf32> to vector<4x4xf32>
    %cst_40 = arith.constant dense<0.000000e+00> : vector<4x256xf32>
    %60 = tpu.matmul %59, %57, %cst_40 {dimension_numbers = #tpu.dot_dimension_numbers<[1], [0], [0], [1], [0, 0, 1, 1], [], []>} : vector<4x4xf32>, vector<4x256xf32>, vector<4x256xf32> -> vector<4x256xf32>
    %61 = arith.addf %54, %60 : vector<4x256xf32>
    %c16_i32 = arith.constant 16 : i32
    %62 = tpu.dynamic_rotate %40 by %c16_i32 dim 1 : vector<4x256xf32>, i32 -> vector<4x256xf32>
    %63 = vector.broadcast %41 : vector<1x256xf32> to vector<4x256xf32>
    %64 = arith.mulf %62, %63 : vector<4x256xf32>
    %c1_41 = arith.constant 1 : index
    %c0_42 = arith.constant 0 : index
    %c0_43 = arith.constant 0 : index
    %65 = vector.load %arg7[%c1_41, %c0_42, %c0_43] : memref<9x4x4xf32, #tpu.memory_space<vmem>>, vector<1x4x4xf32>
    %66 = vector.shape_cast %65 : vector<1x4x4xf32> to vector<4x4xf32>
    %cst_44 = arith.constant dense<0.000000e+00> : vector<4x256xf32>
    %67 = tpu.matmul %66, %64, %cst_44 {dimension_numbers = #tpu.dot_dimension_numbers<[1], [0], [0], [1], [0, 0, 1, 1], [], []>} : vector<4x4xf32>, vector<4x256xf32>, vector<4x256xf32> -> vector<4x256xf32>
    %68 = arith.addf %61, %67 : vector<4x256xf32>
    %c1_i32_45 = arith.constant 1 : i32
    %69 = tpu.dynamic_rotate %64 by %c1_i32_45 dim 1 : vector<4x256xf32>, i32 -> vector<4x256xf32>
    %70 = vector.broadcast %43 : vector<1x256xf32> to vector<4x256xf32>
    %71 = arith.mulf %69, %70 : vector<4x256xf32>
    %c0_46 = arith.constant 0 : index
    %c0_47 = arith.constant 0 : index
    %c0_48 = arith.constant 0 : index
    %72 = vector.load %arg7[%c0_46, %c0_47, %c0_48] : memref<9x4x4xf32, #tpu.memory_space<vmem>>, vector<1x4x4xf32>
    %73 = vector.shape_cast %72 : vector<1x4x4xf32> to vector<4x4xf32>
    %cst_49 = arith.constant dense<0.000000e+00> : vector<4x256xf32>
    %74 = tpu.matmul %73, %71, %cst_49 {dimension_numbers = #tpu.dot_dimension_numbers<[1], [0], [0], [1], [0, 0, 1, 1], [], []>} : vector<4x4xf32>, vector<4x256xf32>, vector<4x256xf32> -> vector<4x256xf32>
    %75 = arith.addf %68, %74 : vector<4x256xf32>
    %c255_i32_50 = arith.constant 255 : i32
    %76 = tpu.dynamic_rotate %64 by %c255_i32_50 dim 1 : vector<4x256xf32>, i32 -> vector<4x256xf32>
    %77 = vector.broadcast %44 : vector<1x256xf32> to vector<4x256xf32>
    %78 = arith.mulf %76, %77 : vector<4x256xf32>
    %c2_51 = arith.constant 2 : index
    %c0_52 = arith.constant 0 : index
    %c0_53 = arith.constant 0 : index
    %79 = vector.load %arg7[%c2_51, %c0_52, %c0_53] : memref<9x4x4xf32, #tpu.memory_space<vmem>>, vector<1x4x4xf32>
    %80 = vector.shape_cast %79 : vector<1x4x4xf32> to vector<4x4xf32>
    %cst_54 = arith.constant dense<0.000000e+00> : vector<4x256xf32>
    %81 = tpu.matmul %80, %78, %cst_54 {dimension_numbers = #tpu.dot_dimension_numbers<[1], [0], [0], [1], [0, 0, 1, 1], [], []>} : vector<4x4xf32>, vector<4x256xf32>, vector<4x256xf32> -> vector<4x256xf32>
    %82 = arith.addf %75, %81 : vector<4x256xf32>
    %c240_i32 = arith.constant 240 : i32
    %83 = tpu.dynamic_rotate %40 by %c240_i32 dim 1 : vector<4x256xf32>, i32 -> vector<4x256xf32>
    %84 = vector.broadcast %42 : vector<1x256xf32> to vector<4x256xf32>
    %85 = arith.mulf %83, %84 : vector<4x256xf32>
    %c7 = arith.constant 7 : index
    %c0_55 = arith.constant 0 : index
    %c0_56 = arith.constant 0 : index
    %86 = vector.load %arg7[%c7, %c0_55, %c0_56] : memref<9x4x4xf32, #tpu.memory_space<vmem>>, vector<1x4x4xf32>
    %87 = vector.shape_cast %86 : vector<1x4x4xf32> to vector<4x4xf32>
    %cst_57 = arith.constant dense<0.000000e+00> : vector<4x256xf32>
    %88 = tpu.matmul %87, %85, %cst_57 {dimension_numbers = #tpu.dot_dimension_numbers<[1], [0], [0], [1], [0, 0, 1, 1], [], []>} : vector<4x4xf32>, vector<4x256xf32>, vector<4x256xf32> -> vector<4x256xf32>
    %89 = arith.addf %82, %88 : vector<4x256xf32>
    %c1_i32_58 = arith.constant 1 : i32
    %90 = tpu.dynamic_rotate %85 by %c1_i32_58 dim 1 : vector<4x256xf32>, i32 -> vector<4x256xf32>
    %91 = vector.broadcast %43 : vector<1x256xf32> to vector<4x256xf32>
    %92 = arith.mulf %90, %91 : vector<4x256xf32>
    %c6 = arith.constant 6 : index
    %c0_59 = arith.constant 0 : index
    %c0_60 = arith.constant 0 : index
    %93 = vector.load %arg7[%c6, %c0_59, %c0_60] : memref<9x4x4xf32, #tpu.memory_space<vmem>>, vector<1x4x4xf32>
    %94 = vector.shape_cast %93 : vector<1x4x4xf32> to vector<4x4xf32>
    %cst_61 = arith.constant dense<0.000000e+00> : vector<4x256xf32>
    %95 = tpu.matmul %94, %92, %cst_61 {dimension_numbers = #tpu.dot_dimension_numbers<[1], [0], [0], [1], [0, 0, 1, 1], [], []>} : vector<4x4xf32>, vector<4x256xf32>, vector<4x256xf32> -> vector<4x256xf32>
    %96 = arith.addf %89, %95 : vector<4x256xf32>
    %c255_i32_62 = arith.constant 255 : i32
    %97 = tpu.dynamic_rotate %85 by %c255_i32_62 dim 1 : vector<4x256xf32>, i32 -> vector<4x256xf32>
    %98 = vector.broadcast %44 : vector<1x256xf32> to vector<4x256xf32>
    %99 = arith.mulf %97, %98 : vector<4x256xf32>
    %c8 = arith.constant 8 : index
    %c0_63 = arith.constant 0 : index
    %c0_64 = arith.constant 0 : index
    %100 = vector.load %arg7[%c8, %c0_63, %c0_64] : memref<9x4x4xf32, #tpu.memory_space<vmem>>, vector<1x4x4xf32>
    %101 = vector.shape_cast %100 : vector<1x4x4xf32> to vector<4x4xf32>
    %cst_65 = arith.constant dense<0.000000e+00> : vector<4x256xf32>
    %102 = tpu.matmul %101, %99, %cst_65 {dimension_numbers = #tpu.dot_dimension_numbers<[1], [0], [0], [1], [0, 0, 1, 1], [], []>} : vector<4x4xf32>, vector<4x256xf32>, vector<4x256xf32> -> vector<4x256xf32>
    %103 = arith.addf %96, %102 : vector<4x256xf32>
    %c0_66 = arith.constant 0 : index
    %c0_67 = arith.constant 0 : index
    %104 = vector.load %arg8[%c0_66, %c0_67] : memref<4x1xf32, #tpu.memory_space<vmem>>, vector<4x1xf32>
    %105 = vector.broadcast %104 : vector<4x1xf32> to vector<4x256xf32>
    %106 = arith.addf %103, %105 : vector<4x256xf32>
    %cst_68 = arith.constant 0.000000e+00 : f32
    %107 = vector.broadcast %cst_68 : f32 to vector<4x256xf32>
    %108 = arith.maximumf %106, %107 : vector<4x256xf32>
    %c0_69 = arith.constant 0 : index
    %c0_70 = arith.constant 0 : index
    %c0_71 = arith.constant 0 : index
    %109 = vector.load %arg11[%c0_69, %c0_70, %c0_71] : memref<1x4x256xf32, #tpu.memory_space<vmem>>, vector<1x4x256xf32>
    %110 = vector.shape_cast %109 : vector<1x4x256xf32> to vector<4x256xf32>
    %111 = vector.shape_cast %108 : vector<4x256xf32> to vector<1x4x256xf32>
    tpu.vector_store %arg11[%c0_69, %c0_70, %c0_71], %111 {strides = array<i32>} : memref<1x4x256xf32, #tpu.memory_space<vmem>>, vector<1x4x256xf32>,
    return
  }
  func.func @transform_0(%arg0: i32) -> (i32, i32, i32) {
    %c0_i32 = arith.constant 0 : i32
    %c0_i32_0 = arith.constant 0 : i32
    %c0_i32_1 = arith.constant 0 : i32
    return %arg0, %c0_i32, %c0_i32_0 : i32, i32, i32
  }
  func.func @transform_1(%arg0: i32) -> (i32, i32, i32, i32) {
    %c0_i32 = arith.constant 0 : i32
    %c0_i32_0 = arith.constant 0 : i32
    %c0_i32_1 = arith.constant 0 : i32
    %c0_i32_2 = arith.constant 0 : i32
    return %arg0, %c0_i32, %c0_i32_0, %c0_i32_1 : i32, i32, i32, i32
  }
  func.func @transform_2(%arg0: i32) -> (i32, i32) {
    %c0_i32 = arith.constant 0 : i32
    %c0_i32_0 = arith.constant 0 : i32
    %c0_i32_1 = arith.constant 0 : i32
    return %c0_i32, %c0_i32_0 : i32, i32
  }
  func.func @transform_3(%arg0: i32) -> (i32, i32) {
    %c0_i32 = arith.constant 0 : i32
    %c0_i32_0 = arith.constant 0 : i32
    %c0_i32_1 = arith.constant 0 : i32
    return %c0_i32, %c0_i32_0 : i32, i32
  }
  func.func @transform_4(%arg0: i32) -> (i32, i32) {
    %c0_i32 = arith.constant 0 : i32
    %c0_i32_0 = arith.constant 0 : i32
    %c0_i32_1 = arith.constant 0 : i32
    return %c0_i32, %c0_i32_0 : i32, i32
  }
  func.func @transform_5(%arg0: i32) -> (i32, i32) {
    %c0_i32 = arith.constant 0 : i32
    %c0_i32_0 = arith.constant 0 : i32
    %c0_i32_1 = arith.constant 0 : i32
    return %c0_i32, %c0_i32_0 : i32, i32
  }
  func.func @transform_6(%arg0: i32) -> (i32, i32, i32) {
    %c0_i32 = arith.constant 0 : i32
    %c0_i32_0 = arith.constant 0 : i32
    %c0_i32_1 = arith.constant 0 : i32
    %c0_i32_2 = arith.constant 0 : i32
    return %c0_i32, %c0_i32_0, %c0_i32_1 : i32, i32, i32
  }
  func.func @transform_7(%arg0: i32) -> (i32, i32) {
    %c0_i32 = arith.constant 0 : i32
    %c0_i32_0 = arith.constant 0 : i32
    %c0_i32_1 = arith.constant 0 : i32
    return %c0_i32, %c0_i32_0 : i32, i32
  }
  func.func @transform_8(%arg0: i32) -> (i32, i32) {
    %c0_i32 = arith.constant 0 : i32
    %c0_i32_0 = arith.constant 0 : i32
    %c0_i32_1 = arith.constant 0 : i32
    return %c0_i32, %c0_i32_0 : i32, i32
  }
  func.func @transform_9(%arg0: i32) -> (i32, i32) {
    %c0_i32 = arith.constant 0 : i32
    %c0_i32_0 = arith.constant 0 : i32
    %c0_i32_1 = arith.constant 0 : i32
    return %c0_i32, %c0_i32_0 : i32, i32
  }
  func.func @transform_10(%arg0: i32) -> (i32, i32, i32) {
    %c0_i32 = arith.constant 0 : i32
    %c0_i32_0 = arith.constant 0 : i32
    %c0_i32_1 = arith.constant 0 : i32
    return %arg0, %c0_i32, %c0_i32_0 : i32, i32, i32
  }
}

</mosaic_0001>

<bundles_post_ra>
// kernel: tpu_custom_call.1
= control target key start
LH: loop header
LB: loop body
LE: loop exit
PB: predicated region body
PF: predicated region fallthrough
CT: control target
= control target key end

     0   :  { %s2595_s0 = inlined_call_operand.hbm [shape: f32[2,4,256], index: 0, kind: input, shape index: {}]   ;;  %s2596_s1 = inlined_call_operand.vmem [shape: f32[2,4,8,8], index: 1, kind: input, shape index: {}]   ;;  %s2597_s2 = inlined_call_operand.hbm [shape: f32[4,256], index: 2, kind: input, shape index: {}]   ;;  %s2598_s3 = inlined_call_operand.hbm [shape: f32[4,4], index: 3, kind: input, shape index: {}]   ;;  %s2599_s4 = inlined_call_operand.hbm [shape: f32[4,4], index: 4, kind: input, shape index: {}]   ;;  %s2600_s5 = inlined_call_operand.vmem [shape: f32[4,1], index: 5, kind: input, shape index: {}]   ;;  %s2601_s6 = inlined_call_operand.vmem [shape: f32[9,4,4], index: 6, kind: input, shape index: {}]   ;;  %s2602_s7 = inlined_call_operand.vmem [shape: f32[4,1], index: 7, kind: input, shape index: {}]   ;;  %s2603_s8 = inlined_call_operand.vmem [shape: f32[16,8], index: 8, kind: input, shape index: {}]   ;;  %s2604_s9 = inlined_call_operand.hbm [shape: f32[8,16], index: 9, kind: input, shape index: {}]   ;;  %s2605_s10 = inlined_call_operand.hbm [shape: f32[2,4,256], index: 10, kind: output, shape index: {}]  }
   0x1   :  { %2606 = sst [smem:[#allocation17_spill]] %s2597_s2 }
   0x2   :  { %2607 = sst [smem:[#allocation18_spill]] %s2598_s3 }
   0x3   :  { %2608 = sst [smem:[#allocation19_spill]] %s2599_s4 }
   0x4   :  { %2609 = sst [smem:[#allocation20_spill]] %s2604_s9 }
   0x5   :  { %15 = vsyncpa [#allocation3], 0 }
   0x6   :  { %17 = vsyncpa [#allocation3 + $0x1], 0 }
   0x7   :  { %18 = vsyncpa [#allocation6], 0 }
   0x8   :  { %19 = vsyncpa [#allocation9], 0 }
   0x9   :  { %20 = vsyncpa [#allocation4], 0 }
   0xa   :  { %22 = vsyncpa [#allocation4 + $0x1], 0  ;;  %s2184_s13 = smov 0   ;;  %s2186_s14 = smov 0  }
   0xb   :  { %s2188_s15 = smov 0   ;;  %s2190_s16 = smov 0  }
   0xc LB: > { %s2610_s2 = sld [smem:[#allocation17_spill]]  ;;  %s2208_s20 = sadd.s32 4294967295, %s2109_s16   ;;  %s2109_s16 = sphi %s2190_s16, %s2629_s16   ;;  %s2105_s15 = sphi %s2188_s15, %s2628_s15   ;;  %s2101_s14 = sphi %s2186_s14, %s2627_s14   ;;  %s2097_s13 = sphi %s2184_s13, %s2626_s13  }
   0xd   : > { %p1689_p0 = scmp.ge.s32.totalorder %s2109_s16, 1  ;;  %p49_p1 = scmp.eq.s32.totalorder %s2208_s20, 0 }
   0xe   : > { %p279_p2 = scmp.lt.s32.totalorder %s2109_s16, 3  ;;  %s2111_s22 = smov [#allocation5]  }
   0xf   : > { %s293_s23 = sshll.u32 %s2111_s22, 4  ;;  %s2612_s4 = sld [smem:[#allocation19_spill]]  ;;  %s294_s23 = int_to_ptr.vmem [resolvable:$true] %s293_s23 }
  0x10   : > { %p2213_p3 = pnand %p1689_p0, %p279_p2  ;;  %s2112_s28 = smov [#allocation8]  }
  0x11   : > { %s317_s29 = sshll.u32 %s2112_s28, 4  ;;  %s2614_s3 = sld [smem:[#allocation18_spill]]  ;;  %s318_s29 = int_to_ptr.vmem [resolvable:$true] %s317_s29 }
  0x12   : > { %s291_s19 = sshll.u32 %s2610_s2, 4  ;;  %p1799_p5 = pneg %p2213_p3  ;;  %s292_s19 = int_to_ptr.hbm [resolvable:$true] %s291_s19 }
  0x13   : > { %s2615_s9 = sld [smem:[#allocation20_spill]]  ;;  %s2113_s24 = smov [#allocation7]  }
  0x14   : > { %p2225_p6 = pnand %p1799_p5, %p49_p1  ;;  %s305_s25 = sshll.u32 %s2113_s24, 4  ;;  %s306_s25 = int_to_ptr.vmem [resolvable:$true] %s305_s25 }
  0x15   : > { %s315_s26 = sshll.u32 %s2612_s4, 4  ;;  %s2245_s28 = sadd.s32 1, %s2109_s16   ;;  %s316_s26 = int_to_ptr.hbm [resolvable:$true] %s315_s26 }
  0x16   : > { %1802 = dma.hbm_to_vmem [thread:$0]  (!%p2225_p6), %s292_s19, 128, %s294_s23, [#allocation6]  }
  0x17   : > { %s303_s12 = sshll.u32 %s2614_s3, 4  ;;  %s2114_s19 = smov [#allocation10]   ;;  %s304_s12 = int_to_ptr.hbm [resolvable:$true] %s303_s12 }
  0x18   : > { %1808 = dma.hbm_to_vmem [thread:$0]  (!%p2225_p6), %s316_s26, 64, %s318_s29, [#allocation9]  }
  0x19   : > { %s339_s22 = sshll.u32 %s2615_s9, 4  ;;  %s341_s23 = sshll.u32 %s2114_s19, 4  ;;  %s340_s22 = int_to_ptr.hbm [resolvable:$true] %s339_s22  ;;  %s342_s23 = int_to_ptr.vmem [resolvable:$true] %s341_s23 }
  0x1a   : > { %1805 = dma.hbm_to_vmem [thread:$0]  (!%p2225_p6), %s304_s12, 64, %s306_s25, [#allocation6]  }
  0x1b   : > { %1811 = dma.hbm_to_vmem [thread:$0]  (!%p2225_p6), %s340_s22, 128, %s342_s23, [#allocation9]  }
  0x1c   : > { %s1688_s26 = sadd.s32 4294967294, %s2109_s16   ;;  %s32_s29 = ssub.s32 %s2109_s16, %s2245_s28 }
  0x1d   : > { %s35_s30 = sadd.s32 1, %s2105_s15  ;;  %p33_p7 = scmp.eq.s32.totalorder %s32_s29, 0 }
  0x1e   : > { %p42_p8 = scmp.ne.s32.totalorder %s2105_s15, %s2101_s14  ;;  %p43_p9 = scmp.eq.s32.totalorder %s2109_s16, 0 }
  0x1f   : > { %p48_p10 = scmp.ne.s32.totalorder %s2101_s14, %s2097_s13  ;;  %p266_p13 = scmp.eq.s32.totalorder %s2208_s20, 1 }
  0x20   : > { %s2256_s11 = scalar_select %p33_p7, %s2105_s15, %s35_s30  }
  0x21   : > { %p2258_p11 = por %p43_p9, %p42_p8  ;;  %p2264_p12 = por %p49_p1, %p48_p10 }
  0x22   : > { %2616 = sst [smem:[#allocation16_spill]] %s2256_s11  ;;  %p272_p0 = scmp.eq.s32.totalorder %s1688_s26, 1 }
  0x23   : > { %p1824_p2 = scmp.lt.s32.totalorder %s2109_s16, 2  ;;  %s352_s17 = sand.u32 1, %s2105_s15  }
  0x24   : > { %p2271_p5 = por %p266_p13, %p42_p8  ;;  %p2275_p6 = por %p272_p0, %p48_p10 }
  0x25   : > { %s1695_s24 = sshll.u32 %s352_s17, 3  ;;  %s1776_s25 = sshll.u32 %s2109_s16, 3 }
  0x26   : > { %s361_s29 = scalar_lea.hbm %s2595_s0, %s1776_s25  ;;  %s356_s30 = scalar_lea.vmem [#allocation2], %s1695_s24 }
  0x27   : > { %s365_s2 = sshll.u32 %s356_s30, 4  ;;  %s363_s3 = sshll.u32 %s361_s29, 4  ;;  %s366_s2 = int_to_ptr.vmem [resolvable:$true] %s365_s2  ;;  %s364_s3 = int_to_ptr.hbm [resolvable:$true] %s363_s3 }
  0x28   : > { %p2285_p7 = pnand %p1824_p2, %p2258_p11  ;;  %s353_s4 = scalar_lea.sflag [#allocation3], %s352_s17 }
  0x29   : > { %s2005_s9 = sshra.s32 %s364_s3, 4  ;;  %s2012_s19 = scalar_lea.hbm %s2595_s0, 16  ;;  %s2006_s9 = int_to_ptr.hbm [resolvable:$true] %s2005_s9 }
  0x2a   : > { %s2007_s11 = scalar_lea.hbm %s2006_s9, 8  ;;  %p2009_p9 = pneg %p2285_p7 }
  0x2b   : > { %p2008_p8 = scmp.ne.s32.totalorder %s2006_s9, %s2007_s11  ;;  %p2013_p11 = scmp.lt.s32.totalorder %s2006_s9, %s2595_s0 }
  0x2c   : > { %p2014_p0 = scmp.lt.s32.totalorder %s2012_s19, %s2007_s11 }
  0x2d   : > { %p2010_p10 = pnand %p2009_p9, %p2008_p8 }
  0x2e   : > { %p2015_p2 = por %p2014_p0, %p2013_p11 }
  0x2f   : > { %p2011_p13 = pneg %p2010_p10 }
  0x31   : > { %p2016_p4 = pnand %p2015_p2, %p2011_p13 }
  0x33   : > { %2019 = shalt.err (!%p2016_p4)
}
  0x34   : > { %1815 = dma.hbm_to_vmem [thread:$0]  (!%p2285_p7), %s364_s3, 128, %s366_s2, %s353_s4  }
  0x35   : > { %382 = sbr.rel (%p2213_p3) target bundleno = 1062 (0x426), region = 60  ;;  %s2302_s17 = sand.u32 (!%p2213_p3), 1, %s2101_s14  }
  0x36   : > { %s1699_s29 = sshll.u32 (!%p2213_p3), %s2302_s17, 3  ;;  %s385_s30 = scalar_lea.sflag (!%p2213_p3), [#allocation3], %s2302_s17 }
  0x37   : > { %s388_s9 = scalar_lea.vmem (!%p2213_p3), [#allocation2], %s1699_s29 }
  0x3a   : > { %2080 = dma.done.wait (%p2264_p12), %s385_s30, 128  }
  0x3b   : > { %2082 = vsyncadd (%p2264_p12), %s385_s30, 4294967168 }
  0x3c   : > { %2084 = dma.done.wait (%p49_p1), [#allocation6], 192  }
  0x3d   : > { %2086 = vsyncadd (%p49_p1), [#allocation6], 4294967104 }
  0x3e   : > { %2088 = dma.done.wait (%p49_p1), [#allocation9], 192  }
  0x3f   : > { %2090 = vsyncadd (%p49_p1), [#allocation9], 4294967104  ;;  %p451_p3 = scmp.lt.s32.totalorder %s2208_s20, 1  ;;  %vm521_vm0 = vcmask 64512   ;;  %v520_v0 = vld [vmem:[#allocation10] sm:$0xff]  ;;  %vm463_vm1 = vcmask 1043456  }
  0x40   : > { %549 = vmatpush.msra.mxu0 %v520_v0  ;;  %v456_v2 = vld [vmem:[%s388_s9] sm:$0xff]  ;;  %v2115_v11 = vmov 256.0   ;;  %v2116_v17 = vmov 839922192   ;;  %v563_v20 = vld [vmem:[%s2603_s8] sm:$0xff]  ;;  %vm664_vm3 = vcmask 1047556  }
  0x41   : > { %s452_s2 = scalar_select %p451_p3, %s2208_s20, 1  ;;  %458 = vst [vmem:[#allocation1] ss:$2 sm:$0xff] %v456_v2  ;;  %1881 = vrcp.f32 %v2115_v11  ;;  %v2331_v18 = vunpack.c.l.s4 %v2116_v17  ;;  %v564_v27 = vld [vmem:[%s2603_s8 + $0x8] sm:$0xff]  ;;  %v2117_v43 = vmov 1983009808  }
  0x42   : > { %v669_v44 = vunpack.c.l.s4 %v2117_v43  ;;  %v2118_v47 = vmov 1934713408   ;;  %s2119_s19 = smov 96   ;;  %s2120_s23 = smov 48   ;;  %vm832_vm7 = vcmask 130048   ;;  %vm834_vm8 = vcmask 261120  }
  0x43   : > { %s1777_s3 = sshll.u32 %s452_s2, 5  ;;  %v480_v22 = vunpack.c.0.s8 %v2331_v18  ;;  %v693_v48 = vunpack.c.l.s4 %v2118_v47  ;;  %s2121_s12 = smov 16   ;;  %vm836_vm9 = vcmask 392192   ;;  %vm838_vm10 = vcmask 523264  }
  0x44   : > { %s455_s11 = scalar_lea.vmem %s2596_s1, %s1777_s3  ;;  %v2356_v46 = vunpack.c.0.s8 %v669_v44  ;;  %s2122_s30 = smov 32   ;;  %vm840_vm11 = vcmask 654336   ;;  %vm844_vm12 = vcmask 916480   ;;  %vm842_vm13 = vcmask 785408  }
  0x45   : > { %v516_v1 = vld [vmem:[%s455_s11] sm:$0xff]  ;;  %v517_v3 = vld [vmem:[%s455_s11 + $0x8] sm:$0xff]  ;;  %v518_v9 = vld [vmem:[%s455_s11 + $0x10] sm:$0xff]  ;;  %v2360_v58 = vunpack.c.0.s8 %v693_v48  ;;  %s2123_s9 = smov 64   ;;  %s2124_s2 = smov 80   ;;  %vm855_vm14 = vcmask 31744  }
  0x46   : > { %1707 = vmatmul.msk.f32.vlgmr.msra.gmra.mxu0 %vm521_vm0, %v516_v1  ;;  %v519_v10 = vld [vmem:[%s455_s11 + $0x18] sm:$0xff]  ;;  %s2125_s3 = smov 112   ;;  %s2127_s11 = smov 1  }
  0x47   : > { %v1882_v12 = vpop.eup %1881  ;;  %s2128_s27 = smov 127   ;;  %s450_s4 = scalar_lea.vmem [#allocation11], %s1699_s29 }
  0x48   : > { %v459_v4 = vld.sshfl [vmem:[#allocation1] sm:$0xff pattern:$0x75316420]  ;;  %v460_v5 = vld.sshfl [vmem:[#allocation1 + $0x8] sm:$0xff pattern:$0x75316420]  ;;  %vm474_vm2 = vweird.f32 %v1882_v12 }
  0x49   : > { %v464_v6 = vsel %vm463_vm1, %v459_v4, 0.0  ;;  %v465_v7 = vsel %vm463_vm1, %v460_v5, 0.0  ;;  %v470_v13 = vmul.f32 256.0, %v1882_v12  ;;  %s1565_s21 = sshll.u32 %s450_s4, 4  ;;  %s2055_s29 = scalar_lea.hbm %s2605_s10, 16  ;;  %s1566_s21 = int_to_ptr.vmem [resolvable:$true] %s1565_s21 }
  0x4a   : > { %v466_v8 = vadd.f32 %v465_v7, %v464_v6 }
  0x4b   : > { %v471_v14 = vsub.f32 1.0, %v470_v13 }
  0x4c   : > { %467 = vadd.xlane.f32.xlu0 %v466_v8 }
  0x4d   : > { %v472_v15 = vmul.f32 %v1882_v12, %v471_v14 }
  0x4e   : > { %1708 = vmatmul.msk.f32.gmra.mxu0 %vm521_vm0, %v517_v3 }
  0x4f   : > { %v473_v16 = vadd.f32 %v1882_v12, %v472_v15 }
  0x51   : > { %v475_v19 = vsel %vm474_vm2, %v1882_v12, %v473_v16 }
  0x56   : > { %1709 = vmatmul.msk.f32.gmra.mxu0 %vm521_vm0, %v518_v9 }
  0x5e   : > { %1710 = vmatmul.msk.f32.gmra.mxu0 %vm521_vm0, %v519_v10 }
  0xbf   : > { %v468_v23 = vpop.xlane.xlu0 %467 }
  0xc0   : > { %v476_v24 = vmul.f32 %v475_v19, %v468_v23 }
  0xc2   : > { %v481_v25 = vperm.slane %v476_v24, %v480_v22 }
  0xc3   : > { %v551_v21 = vpop.f32.mrf.mxu0 }
  0xc4   : > { %586 = vmatpush.msra.mxu1 %v551_v21  ;;  %v2340_v26 = vsub.f32 %v456_v2, %v481_v25 }
  0xc5   : > { %1711 = vmatmul.msk.f32.vlgmr.msra.gmra.mxu1 %vm521_vm0, %v563_v20 }
  0xc6   : > { %v484_v29 = vmul.f32 %v2340_v26, %v2340_v26 }
  0xc8   : > { %486 = vst [vmem:[#allocation1] ss:$2 sm:$0xff] %v484_v29 }
  0xcb   : > { %v554_v28 = vpop.f32.mrf.mxu0 }
  0xcc   : > { %609 = vmatpush.msra.mxu2 %v554_v28 }
  0xcd   : > { %1712 = vmatmul.msk.f32.gmra.mxu1 %vm521_vm0, %v564_v27  ;;  %1713 = vmatmul.msk.f32.vlgmr.msra.gmra.mxu2 %vm521_vm0, %v563_v20 }
  0xcf   : > { %v487_v31 = vld.sshfl [vmem:[#allocation1] sm:$0xff pattern:$0x75316420]  ;;  %v488_v32 = vld.sshfl [vmem:[#allocation1 + $0x8] sm:$0xff pattern:$0x75316420] }
  0xd0   : > { %v491_v33 = vsel %vm463_vm1, %v487_v31, 0.0  ;;  %v492_v34 = vsel %vm463_vm1, %v488_v32, 0.0 }
  0xd1   : > { %v493_v35 = vadd.f32 %v492_v34, %v491_v33 }
  0xd3   : > { %v557_v30 = vpop.f32.mrf.mxu0  ;;  %494 = vadd.xlane.f32.xlu0 %v493_v35 }
  0xd4   : > { %632 = vmatpush.msra.mxu3 %v557_v30 }
  0xd5   : > { %1715 = vmatmul.msk.f32.vlgmr.msra.gmra.mxu3 %vm521_vm0, %v563_v20  ;;  %1714 = vmatmul.msk.f32.gmra.mxu2 %vm521_vm0, %v564_v27 }
  0xdb   : > { %v560_v36 = vpop.f32.mrf.mxu0 }
  0xdc   : > { %655 = vmatpush.msrb.mxu1 %v560_v36 }
  0xdd   : > { %1716 = vmatmul.msk.f32.gmra.mxu3 %vm521_vm0, %v564_v27  ;;  %1717 = vmatmul.msk.f32.vlgmr.msrb.gmra.mxu1 %vm521_vm0, %v563_v20 }
  0xe5   : > { %1718 = vmatmul.msk.f32.gmra.mxu1 %vm521_vm0, %v564_v27 }
 0x142   : > { %v588_v37 = vpop.f32.mrf.mxu1 }
 0x143   : > { %v666_v49 = vrot.slane %v588_v37, 4 }
 0x146   : > { %v495_v38 = vpop.xlane.xlu0 %494 }
 0x147   : > { %v496_v39 = vmul.f32 %v495_v38, %v475_v19 }
 0x149   : > { %v497_v40 = vadd.f32 1e-05, %v496_v39 }
 0x14a   : > { %v591_v41 = vpop.f32.mrf.mxu1 }
 0x14b   : > { %1883 = vrsqrt.f32 %v497_v40  ;;  %vm504_vm4 = vweird.f32 %v497_v40  ;;  %v722_v9 = vrot.slane %v591_v41, 4 }
 0x150   : > { %v611_v42 = vpop.f32.mrf.mxu2 }
 0x151   : > { %v1884_v45 = vpop.eup %1883  ;;  %v678_v51 = vrot.slane %v611_v42, 4 }
 0x152   : > { %v499_v50 = vmul.f32 %v1884_v45, %v497_v40  ;;  %vm505_vm5 = vweird.f32 %v1884_v45 }
 0x153   : > { %vm2368_vm6 = vmor %vm504_vm4, %vm505_vm5 }
 0x154   : > { %v500_v53 = vmul.f32 %v1884_v45, %v499_v50 }
 0x156   : > { %v501_v59 = vmul.f32 0.5, %v500_v53 }
 0x158   : > { %v634_v52 = vpop.f32.mrf.mxu3  ;;  %v614_v2 = vpop.f32.mrf.mxu2  ;;  %v502_v3 = vsub.f32 1.5, %v501_v59 }
 0x159   : > { %v663_v54 = vrot.slane %v634_v52, 4  ;;  %v667_v55 = vsel %vm664_vm3, %v634_v52, %v666_v49  ;;  %v734_v11 = vrot.slane %v614_v2, 4 }
 0x15a   : > { %v675_v56 = vperm.slane %v667_v55, %v2356_v46  ;;  %v657_v57 = vpop.f32.mrf.mxu1  ;;  %v503_v10 = vmul.f32 %v1884_v45, %v502_v3 }
 0x15b   : > { %v665_v60 = vsel %vm664_vm3, %v663_v54, %v588_v37  ;;  %v676_v61 = vrot.slane %v657_v57, 4  ;;  %v679_v62 = vsel %vm664_vm3, %v657_v57, %v678_v51 }
 0x15c   : > { %v671_v63 = vperm.slane %v665_v60, %v2356_v46  ;;  %v702_v0 = vrot.slane %v675_v56, 4  ;;  %v687_v1 = vperm.slane %v679_v62, %v2356_v46  ;;  %v507_v16 = vsel %vm2368_vm6, %v1884_v45, %v503_v10 }
 0x15d   : > { %v677_v4 = vsel %vm664_vm3, %v676_v61, %v611_v42  ;;  %v512_v20 = vperm.slane %v507_v16, %v480_v22 }
 0x15e   : > { %v690_v6 = vrot.slane %v671_v63, 4  ;;  %v683_v7 = vperm.slane %v677_v4, %v2356_v46  ;;  %v703_v8 = vsel %vm664_vm3, %v687_v1, %v702_v0  ;;  %v700_v40 = vrot.slane %v687_v1, 4 }
 0x15f   : > { %v2375_v12 = vperm.slane %v703_v8, %v2360_v58  ;;  %v514_v31 = vmul.f32 %v512_v20, %v2340_v26  ;;  %v956_v8 = vld [vmem:[%s2600_s5] sm:$0xf] }
 0x160   : > { %v688_v13 = vrot.slane %v683_v7, 4  ;;  %v637_v14 = vpop.f32.mrf.mxu3  ;;  %v691_v15 = vsel %vm664_vm3, %v683_v7, %v690_v6  ;;  %v701_v44 = vsel %vm664_vm3, %v700_v40, %v675_v56 }
 0x161   : > { %v720_v17 = vrot.slane %v637_v14, 4  ;;  %v723_v19 = vsel %vm664_vm3, %v637_v14, %v722_v9  ;;  %797 = vrot.lane.b32.xlu2 %v2375_v12, %s2119_s19  ;;  %v699_v24 = vperm.slane %v691_v15, %v2360_v58  ;;  %v515_v35 = vmax.f32 %v514_v31, 0.0 }
 0x162   : > { %v731_v21 = vperm.slane %v723_v19, %v2356_v46  ;;  %v660_v23 = vpop.f32.mrf.mxu1  ;;  %v689_v25 = vsel %vm664_vm3, %v688_v13, %v671_v63  ;;  %v718_v0 = vrot.slane %v2375_v12, 4  ;;  %v2126_v9 = vmov 0  }
 0x163   : > { %v721_v27 = vsel %vm664_vm3, %v720_v17, %v591_v41  ;;  %v732_v28 = vrot.slane %v660_v23, 4  ;;  %v735_v29 = vsel %vm664_vm3, %v660_v23, %v734_v11  ;;  %v2391_v30 = vperm.slane %v689_v25, %v2360_v58  ;;  %906 = vst [vmem:[#allocation1] ss:$2 sm:$0xff] %v515_v35  ;;  %1880 = vset.pattern.permute.xlu0 %v2126_v9  ;;  %v853_v35 = vld [vmem:[#allocation7] sm:$0xf] }
 0x164   : > { %v727_v18 = vperm.slane %v721_v27, %v2356_v46  ;;  %v743_v22 = vperm.slane %v735_v29, %v2356_v46  ;;  %v714_v33 = vrot.slane %v699_v24, 4  ;;  %v758_v36 = vrot.slane %v731_v21, 4 }
 0x165   : > { %v733_v32 = vsel %vm664_vm3, %v732_v28, %v614_v2  ;;  %v712_v34 = vrot.slane %v2391_v30, 4  ;;  %v719_v1 = vsel %vm664_vm3, 0.0, %v718_v0 }
 0x166   : > { %v756_v37 = vrot.slane %v743_v22, 4  ;;  %v715_v38 = vsel %vm664_vm3, 0.0, %v714_v33  ;;  %v746_v41 = vrot.slane %v727_v18, 4  ;;  %v739_v26 = vperm.slane %v733_v32, %v2356_v46 }
 0x167   : > { %v713_v39 = vsel %vm664_vm3, 0.0, %v712_v34  ;;  %785 = vrot.lane.b32.xlu0 %v715_v38, %s2120_s23  ;;  %v759_v42 = vsel %vm664_vm3, %v743_v22, %v758_v36  ;;  %v707_v46 = vperm.slane %v701_v44, %v2360_v58 }
 0x168   : > { %777 = vrot.lane.b32.xlu1 %v713_v39, %s2121_s12  ;;  %v757_v43 = vsel %vm664_vm3, %v756_v37, %v731_v21  ;;  %v747_v45 = vsel %vm664_vm3, %v739_v26, %v746_v41  ;;  %v767_v47 = vperm.slane %v759_v42, %v2360_v58  ;;  %v744_v53 = vrot.slane %v739_v26, 4 }
 0x169   : > { %781 = vrot.lane.b32.xlu2 %v699_v24, %s2122_s30  ;;  %v763_v48 = vperm.slane %v757_v43, %v2360_v58  ;;  %v755_v49 = vperm.slane %v747_v45, %v2360_v58  ;;  %v716_v51 = vrot.slane %v707_v46, 4 }
 0x16a   : > { %v745_v56 = vsel %vm664_vm3, %v744_v53, %v727_v18  ;;  %v774_v61 = vrot.slane %v767_v47, 4  ;;  %v908_v32 = vld.sshfl [vmem:[#allocation1 + $0x8] sm:$0xff pattern:$0x75316420] }
 0x16b   : > { %v770_v50 = vrot.slane %v755_v49, 4  ;;  %v717_v54 = vsel %vm664_vm3, 0.0, %v716_v51  ;;  %v772_v55 = vrot.slane %v763_v48, 4  ;;  %v751_v59 = vperm.slane %v745_v56, %v2360_v58  ;;  %v907_v34 = vld.sshfl [vmem:[#allocation1] sm:$0xff pattern:$0x75316420] }
 0x16c   : > { %v775_v63 = vsel %vm664_vm3, 0.0, %v774_v61 }
 0x16d   : > { %v771_v52 = vsel %vm664_vm3, 0.0, %v770_v50  ;;  %v773_v57 = vsel %vm664_vm3, 0.0, %v772_v55  ;;  %v768_v60 = vrot.slane %v751_v59, 4 }
 0x16f   : > { %825 = vrot.lane.b32.xlu0 %v767_v47, %s2119_s19  ;;  %v769_v62 = vsel %vm664_vm3, 0.0, %v768_v60  ;;  %v979_v47 = vlaneseq }
 0x170   : > { %817 = vrot.lane.b32.xlu1 %v763_v48, %s2123_s9 }
 0x171   : > { %789 = vrot.lane.b32.xlu2 %v707_v46, %s2123_s9  ;;  %v2447_v48 = vand.u32 127, %v979_v47  ;;  %v966_v46 = vld [vmem:[#allocation5] ss:$4 sm:$0x3] }
 0x172   : > { %v1166_v50 = vperm.slane %v966_v46, 0  ;;  %v1167_v51 = vperm.slane %v966_v46, 1 }
 0x173   : > { %vm1162_vm15 = vcmp.lt.s32.totalorder %v2447_v48, 16  ;;  %vm1350_vm0 = vcmp.lt.s32.totalorder %v2447_v48, 112  ;;  %vm1095_vm2 = vcmp.lt.s32.totalorder %v2447_v48, 127  ;;  %vm981_vm3 = vcmp.lt.s32.totalorder %v2447_v48, 1 }
 0x177   : > { %959 = vperm.xlu0 %1880, %v956_v8  }
 0x178   : > { %813 = vrot.lane.b32.xlu1 %v771_v52, %s2120_s23 }
 0x179   : > { %793 = vrot.lane.b32.xlu2 %v717_v54, %s2124_s2 }
 0x180   : > { %821 = vrot.lane.b32.xlu1 %v773_v57, %s2124_s2  ;;  %v968_v57 = vld [vmem:[#allocation5 + $0x1] ss:$4 sm:$0x3] }
 0x181   : > { %809 = vrot.lane.b32.xlu2 %v755_v49, %s2122_s30  ;;  %v1354_v61 = vperm.slane %v968_v57, 0  ;;  %s1778_s30 = sshll.u32 %s2208_s20, 3  ;;  %s1552_s20 = scalar_lea.sflag [#allocation4], %s2302_s17 }
 0x188   : > { %805 = vrot.lane.b32.xlu1 %v769_v62, %s2121_s12  ;;  %v1355_v62 = vperm.slane %v968_v57, 1 }
 0x189   : > { %829 = vrot.lane.b32.xlu2 %v775_v63, %s2125_s3 }
 0x190   : > { %801 = vrot.lane.b32.xlu1 %v719_v1, %s2125_s3 }
 0x1bb   : > { %v798_v58 = vpop.permute.xlu2 %797 }
 0x1c3   : > { %v782_v2 = vpop.permute.xlu2 %781 }
 0x1cb   : > { %v790_v4 = vpop.permute.xlu2 %789 }
 0x1d3   : > { %v794_v7 = vpop.permute.xlu2 %793 }
 0x1d9   : > { %v786_v12 = vpop.permute.xlu0 %785 }
 0x1da   : > { %v778_v3 = vpop.permute.xlu1 %777 }
 0x1db   : > { %v833_v11 = vsel %vm832_vm7, %v2391_v30, %v778_v3  ;;  %v810_v14 = vpop.permute.xlu2 %809  ;;  %v854_v30 = vld [vmem:[#allocation8] sm:$0xf]  ;;  %v970_v3 = vld [vmem:[#allocation5 + $0x2] ss:$4 sm:$0x3] }
 0x1dc   : > { %v835_v13 = vsel %vm834_vm8, %v833_v11, %v782_v2 }
 0x1dd   : > { %v837_v15 = vsel %vm836_vm9, %v835_v13, %v786_v12 }
 0x1de   : > { %v839_v20 = vsel %vm838_vm10, %v837_v15, %v790_v4  ;;  %v972_v4 = vld [vmem:[#allocation5 + $0x3] ss:$4 sm:$0x3]  ;;  %v1535_v15 = vld [vmem:[%s2602_s7] sm:$0xf] }
 0x1df   : > { %v841_v27 = vsel %vm840_vm11, %v839_v20, %v794_v7  ;;  %v986_v7 = vperm.slane %v970_v3, 1  ;;  %v2461_v9 = vperm.slane %v972_v4, 0  ;;  %v2463_v11 = vperm.slane %v972_v4, 1 }
 0x1e0   : > { %v843_v22 = vsel %vm842_vm13, %v841_v27, %v798_v58  ;;  %v1737_v27 = vld [vmem:[%s2601_s6 + $0x14] sm:$0xf] }
 0x1e1   : > { %v826_v24 = vpop.permute.xlu0 %825 }
 0x1e2   : > { %v818_v5 = vpop.permute.xlu1 %817 }
 0x1e3   : > { %v830_v28 = vpop.permute.xlu2 %829 }
 0x1e9   : > { %v960_v39 = vpop.permute.xlu0 %959 }
 0x1ea   : > { %v814_v6 = vpop.permute.xlu1 %813 }
 0x1f2   : > { %v822_v10 = vpop.permute.xlu1 %821 }
 0x1fa   : > { %v806_v16 = vpop.permute.xlu1 %805 }
 0x1fb   : > { %v846_v17 = vsel %vm832_vm7, %v751_v59, %v806_v16 }
 0x1fc   : > { %v847_v19 = vsel %vm834_vm8, %v846_v17, %v810_v14 }
 0x1fd   : > { %v848_v21 = vsel %vm836_vm9, %v847_v19, %v814_v6  ;;  %v985_v6 = vperm.slane %v970_v3, 0 }
 0x1fe   : > { %v849_v23 = vsel %vm838_vm10, %v848_v21, %v818_v5 }
 0x1ff   : > { %v850_v25 = vsel %vm840_vm11, %v849_v23, %v822_v10  ;;  %v1727_v23 = vld [vmem:[%s2601_s6 + $0x10] sm:$0xf] }
 0x200   : > { %v851_v29 = vsel %vm842_vm13, %v850_v25, %v826_v24  ;;  %v1728_v24 = vld [vmem:[%s2601_s6 + $0xc] sm:$0xf]  ;;  %v1742_v25 = vld [vmem:[%s2601_s6 + $0x4] sm:$0xf] }
 0x201   : > { %v852_v31 = vsel %vm844_vm12, %v851_v29, %v830_v28 }
 0x202   : > { %v802_v18 = vpop.permute.xlu1 %801  ;;  %1721 = vmatpush.msk.msrb.mxu3 %vm463_vm1, %v852_v31 }
 0x203   : > { %1722 = vmatmul.msk.f32.vlgmr.msrb.gmra.mxu3 %vm855_vm14, %v854_v30  ;;  %v845_v33 = vsel %vm844_vm12, %v843_v22, %v802_v18 }
 0x204   : > { %1725 = vmatpush.msk.msra.mxu3 %vm463_vm1, %v908_v32  ;;  %1719 = vmatpush.msk.msrb.mxu2 %vm463_vm1, %v845_v33  ;;  %v1233_v33 = vld [vmem:[%s2601_s6] sm:$0xf] }
 0x205   : > { %1720 = vmatmul.msk.f32.vlgmr.msrb.gmra.mxu2 %vm855_vm14, %v854_v30 }
 0x206   : > { %1723 = vmatpush.msk.msra.mxu2 %vm463_vm1, %v907_v34 }
 0x20b   : > { %1726 = vmatmul.msk.f32.vlgmr.msra.gmra.mxu3 %vm855_vm14, %v853_v35 }
 0x20d   : > { %1724 = vmatmul.msk.f32.vlgmr.msra.gmra.mxu2 %vm855_vm14, %v853_v35 }
 0x286   : > { %v902_v36 = vpop.f32.mrf.mxu3 }
 0x288   : > { %v882_v37 = vpop.f32.mrf.mxu2 }
 0x28e   : > { %v953_v38 = vpop.f32.mrf.mxu3 }
 0x28f   : > { %v954_v40 = vadd.f32 %v953_v38, %v902_v36 }
 0x290   : > { %v933_v41 = vpop.f32.mrf.mxu2 }
 0x291   : > { %v934_v26 = vadd.f32 %v933_v41, %v882_v37  ;;  %v963_v42 = vadd.f32 %v960_v39, %v954_v40 }
 0x293   : > { %v962_v43 = vadd.f32 %v960_v39, %v934_v26  ;;  %v965_v44 = vmax.f32 %v963_v42, 0.0 }
 0x295   : > { %v964_v45 = vmax.f32 %v962_v43, 0.0  ;;  %1160 = vrot.lane.b32.xlu2 %v965_v44, %s2121_s12  ;;  %1735 = vmatpush.msk.msrb.mxu3 %vm463_vm1, %v965_v44 }
 0x296   : > { %1736 = vmatmul.msk.f32.vlgmr.msrb.gmra.mxu3 %vm855_vm14, %v1727_v23 }
 0x297   : > { %975 = vrot.lane.b32.xlu0 %v964_v45, %s2127_s11  ;;  %1158 = vrot.lane.b32.xlu1 %v964_v45, %s2121_s12 }
 0x298   : > { %1733 = vmatpush.msk.msrb.mxu2 %vm463_vm1, %v964_v45 }
 0x299   : > { %1734 = vmatmul.msk.f32.vlgmr.msrb.gmra.mxu2 %vm855_vm14, %v1727_v23 }
 0x29d   : > { %1348 = vrot.lane.b32.xlu2 %v965_v44, %s2125_s3 }
 0x29f   : > { %1093 = vrot.lane.b32.xlu0 %v965_v44, %s2128_s27  ;;  %1346 = vrot.lane.b32.xlu1 %v964_v45, %s2125_s3  ;;  %s1563_s3 = scalar_lea.hbm %s2605_s10, %s1778_s30 }
 0x2a5   : > { %1091 = vrot.lane.b32.xlu2 %v964_v45, %s2128_s27  ;;  %v1756_v45 = vld [vmem:[%s2601_s6 + $0x1c] sm:$0xf] }
 0x2a7   : > { %977 = vrot.lane.b32.xlu1 %v965_v44, %s2127_s11  ;;  %v1751_v44 = vld [vmem:[%s2601_s6 + $0x8] sm:$0xf] }
 0x2ef   : > { %v1161_v49 = vpop.permute.xlu2 %1160 }
 0x2f7   : > { %v1349_v60 = vpop.permute.xlu2 %1348 }
 0x2ff   : > { %v1092_v8 = vpop.permute.xlu2 %1091 }
 0x309   : > { %v1159_v52 = vpop.permute.xlu1 %1158  ;;  %v976_v59 = vpop.permute.xlu0 %975 }
 0x30a   : > { %v1163_v53 = vsel %vm1162_vm15, %v1159_v52, %v1161_v49  ;;  %v1164_v54 = vsel %vm1162_vm15, %v1161_v49, %v1159_v52 }
 0x30b   : > { %v1170_v55 = vmul.f32 %v1166_v50, %v1164_v54  ;;  %v1171_v56 = vmul.f32 %v1167_v51, %v1163_v53  ;;  %v1761_v53 = vld [vmem:[%s2601_s6 + $0x18] sm:$0xf]  ;;  %v1766_v54 = vld [vmem:[%s2601_s6 + $0x20] sm:$0xf] }
 0x30d   : > { %1285 = vrot.lane.b32.xlu0 %v1170_v55, %s2128_s27  ;;  %1225 = vrot.lane.b32.xlu1 %v1170_v55, %s2127_s11 }
 0x30e   : > { %1227 = vrot.lane.b32.xlu2 %v1171_v56, %s2127_s11  ;;  %1743 = vmatpush.msk.msra.mxu2 %vm463_vm1, %v1170_v55 }
 0x30f   : > { %1745 = vmatpush.msk.msra.mxu3 %vm463_vm1, %v1171_v56  ;;  %1744 = vmatmul.msk.f32.vlgmr.msra.gmra.mxu2 %vm855_vm14, %v1742_v25 }
 0x310   : > { %1746 = vmatmul.msk.f32.vlgmr.msra.gmra.mxu3 %vm855_vm14, %v1742_v25 }
 0x311   : > { %v1347_v63 = vpop.permute.xlu1 %1346  ;;  %v1094_v5 = vpop.permute.xlu0 %1093 }
 0x312   : > { %v1351_v0 = vsel %vm1350_vm0, %v1347_v63, %v1349_v60  ;;  %v1352_v1 = vsel %vm1350_vm0, %v1349_v60, %v1347_v63  ;;  %v1096_v12 = vsel %vm1095_vm2, %v1092_v8, %v1094_v5  ;;  %v1097_v16 = vsel %vm1095_vm2, %v1094_v5, %v1092_v8 }
 0x313   : > { %v1358_v58 = vmul.f32 %v1354_v61, %v1351_v0  ;;  %v1359_v2 = vmul.f32 %v1355_v62, %v1352_v1  ;;  %v1103_v20 = vmul.f32 %v2461_v9, %v1096_v12  ;;  %v1104_v21 = vmul.f32 %v2463_v11, %v1097_v16 }
 0x315   : > { %1287 = vrot.lane.b32.xlu1 %v1171_v56, %s2128_s27  ;;  %1415 = vrot.lane.b32.xlu0 %v1359_v2, %s2127_s11 }
 0x316   : > { %1413 = vrot.lane.b32.xlu2 %v1358_v58, %s2127_s11  ;;  %s1567_s11 = sshll.u32 %s1563_s3, 4  ;;  %s1568_s11 = int_to_ptr.hbm [resolvable:$true] %s1567_s11 }
 0x319   : > { %v978_v10 = vpop.permute.xlu1 %977  ;;  %v1088_v60 = vpop.f32.mrf.mxu3 }
 0x31a   : > { %v982_v13 = vsel %vm981_vm3, %v976_v59, %v978_v10  ;;  %v983_v14 = vsel %vm981_vm3, %v978_v10, %v976_v59 }
 0x31b   : > { %v989_v17 = vmul.f32 %v985_v6, %v983_v14  ;;  %v990_v19 = vmul.f32 %v986_v7, %v982_v13 }
 0x31c   : > { %v1068_v59 = vpop.f32.mrf.mxu2 }
 0x31d   : > { %1538 = vperm.xlu0 %1880, %v1535_v15   ;;  %1474 = vrot.lane.b32.xlu1 %v1358_v58, %s2128_s27 }
 0x31e   : > { %1476 = vrot.lane.b32.xlu2 %v1359_v2, %s2128_s27  ;;  %1729 = vmatpush.msk.msrb.mxu0 %vm463_vm1, %v989_v17  ;;  %s2049_s27 = sshra.s32 %s1568_s11, 4  ;;  %s2050_s27 = int_to_ptr.hbm [resolvable:$true] %s2049_s27 }
 0x31f   : > { %1731 = vmatpush.msk.msra.mxu1 %vm463_vm1, %v990_v19  ;;  %1730 = vmatmul.msk.f32.vlgmr.msrb.gmra.mxu0 %vm855_vm14, %v1728_v24  ;;  %s2051_s26 = scalar_lea.hbm %s2050_s27, 8  ;;  %p2056_p7 = scmp.lt.s32.totalorder %s2050_s27, %s2605_s10 }
 0x320   : > { %1738 = vmatpush.msk.msra.mxu0 %vm463_vm1, %v1103_v20  ;;  %1732 = vmatmul.msk.f32.vlgmr.msra.gmra.mxu1 %vm855_vm14, %v1728_v24  ;;  %p2052_p1 = scmp.ne.s32.totalorder %s2050_s27, %s2051_s26  ;;  %p2057_p8 = scmp.lt.s32.totalorder %s2055_s29, %s2051_s26 }
 0x321   : > { %1740 = vmatpush.msk.msrb.mxu1 %vm463_vm1, %v1104_v21 }
 0x322   : > { %p2053_p4 = pnand %p2052_p1, %p2271_p5  ;;  %p2058_p9 = por %p2057_p8, %p2056_p7 }
 0x324   : > { %p2054_p12 = pneg %p2053_p4 }
 0x326   : > { %p2059_p10 = pnand %p2058_p9, %p2054_p12 }
 0x327   : > { %1739 = vmatmul.msk.f32.vlgmr.msra.gmra.mxu0 %vm855_vm14, %v1737_v27 }
 0x328   : > { %1741 = vmatmul.msk.f32.vlgmr.msrb.gmra.mxu1 %vm855_vm14, %v1737_v27 }
 0x368   : > { %v1228_v28 = vpop.permute.xlu2 %1227 }
 0x370   : > { %v1414_v34 = vpop.permute.xlu2 %1413 }
 0x378   : > { %v1477_v47 = vpop.permute.xlu2 %1476 }
 0x37f   : > { %v1286_v29 = vpop.permute.xlu0 %1285  ;;  %v1226_v30 = vpop.permute.xlu1 %1225 }
 0x380   : > { %v1229_v31 = vsel %vm981_vm3, %v1226_v30, %v1228_v28  ;;  %v1230_v18 = vsel %vm981_vm3, %v1228_v28, %v1226_v30 }
 0x381   : > { %v1231_v22 = vmul.f32 %v1230_v18, %v985_v6  ;;  %v1232_v32 = vmul.f32 %v1229_v31, %v986_v7 }
 0x383   : > { %1747 = vmatpush.msk.msrb.mxu0 %vm463_vm1, %v1231_v22  ;;  %1749 = vmatpush.msk.msra.mxu1 %vm463_vm1, %v1232_v32 }
 0x384   : > { %1748 = vmatmul.msk.f32.vlgmr.msrb.gmra.mxu0 %vm855_vm14, %v1233_v33  ;;  %1750 = vmatmul.msk.f32.vlgmr.msra.gmra.mxu1 %vm855_vm14, %v1233_v33 }
 0x385   : > { %1757 = vmatpush.msk.msra.mxu0 %vm463_vm1, %v1358_v58  ;;  %1759 = vmatpush.msk.msrb.mxu1 %vm463_vm1, %v1359_v2 }
 0x387   : > { %v1416_v35 = vpop.permute.xlu0 %1415  ;;  %v1288_v36 = vpop.permute.xlu1 %1287 }
 0x388   : > { %v1417_v37 = vsel %vm981_vm3, %v1414_v34, %v1416_v35  ;;  %v1418_v38 = vsel %vm981_vm3, %v1416_v35, %v1414_v34  ;;  %v1289_v39 = vsel %vm1095_vm2, %v1286_v29, %v1288_v36  ;;  %v1290_v40 = vsel %vm1095_vm2, %v1288_v36, %v1286_v29 }
 0x389   : > { %v1419_v41 = vmul.f32 %v1418_v38, %v985_v6  ;;  %v1420_v26 = vmul.f32 %v1417_v37, %v986_v7  ;;  %v1291_v42 = vmul.f32 %v1289_v39, %v2461_v9  ;;  %v1292_v43 = vmul.f32 %v1290_v40, %v2463_v11 }
 0x38b   : > { %1752 = vmatpush.msk.msrb.mxu2 %vm463_vm1, %v1291_v42  ;;  %1754 = vmatpush.msk.msrb.mxu3 %vm463_vm1, %v1292_v43 }
 0x38c   : > { %1753 = vmatmul.msk.f32.vlgmr.msrb.gmra.mxu2 %vm855_vm14, %v1751_v44  ;;  %1755 = vmatmul.msk.f32.vlgmr.msrb.gmra.mxu3 %vm855_vm14, %v1751_v44 }
 0x38d   : > { %1762 = vmatpush.msk.msra.mxu2 %vm463_vm1, %v1419_v41  ;;  %1764 = vmatpush.msk.msra.mxu3 %vm463_vm1, %v1420_v26 }
 0x38e   : > { %1758 = vmatmul.msk.f32.vlgmr.msra.gmra.mxu0 %vm855_vm14, %v1756_v45  ;;  %1760 = vmatmul.msk.f32.vlgmr.msrb.gmra.mxu1 %vm855_vm14, %v1756_v45 }
 0x38f   : > { %v1475_v46 = vpop.permute.xlu1 %1474  ;;  %v1539_v27 = vpop.permute.xlu0 %1538 }
 0x390   : > { %v1478_v49 = vsel %vm1095_vm2, %v1475_v46, %v1477_v47  ;;  %v1479_v50 = vsel %vm1095_vm2, %v1477_v47, %v1475_v46 }
 0x391   : > { %v1480_v51 = vmul.f32 %v1478_v49, %v2461_v9  ;;  %v1481_v52 = vmul.f32 %v1479_v50, %v2463_v11 }
 0x392   : > { %v1200_v1 = vpop.f32.mrf.mxu2 }
 0x393   : > { %1767 = vmatpush.msk.msrb.mxu0 %vm463_vm1, %v1480_v51  ;;  %1769 = vmatpush.msk.msra.mxu1 %vm463_vm1, %v1481_v52  ;;  %v1220_v58 = vpop.f32.mrf.mxu3 }
 0x394   : > { %1763 = vmatmul.msk.f32.vlgmr.msra.gmra.mxu2 %vm855_vm14, %v1761_v53  ;;  %1765 = vmatmul.msk.f32.vlgmr.msra.gmra.mxu3 %vm855_vm14, %v1761_v53 }
 0x396   : > { %1768 = vmatmul.msk.f32.vlgmr.msrb.gmra.mxu0 %vm855_vm14, %v1766_v54  ;;  %1770 = vmatmul.msk.f32.vlgmr.msra.gmra.mxu1 %vm855_vm14, %v1766_v54 }
 0x39c   : > { %v1019_v48 = vpop.f32.mrf.mxu0 }
 0x39d   : > { %v1039_v55 = vpop.f32.mrf.mxu1  ;;  %v1069_v61 = vadd.f32 %v1068_v59, %v1019_v48 }
 0x39e   : > { %v1089_v0 = vadd.f32 %v1088_v60, %v1039_v55 }
 0x3a4   : > { %v1133_v56 = vpop.f32.mrf.mxu0 }
 0x3a5   : > { %v1153_v57 = vpop.f32.mrf.mxu1  ;;  %v1156_v2 = vadd.f32 %v1133_v56, %v1069_v61 }
 0x3a6   : > { %v1157_v3 = vadd.f32 %v1153_v57, %v1089_v0 }
 0x3a7   : > { %v1223_v4 = vadd.f32 %v1200_v1, %v1156_v2 }
 0x3a8   : > { %v1224_v7 = vadd.f32 %v1220_v58, %v1157_v3 }
 0x401   : > { %v1260_v62 = vpop.f32.mrf.mxu0  ;;  %v1280_v63 = vpop.f32.mrf.mxu1 }
 0x402   : > { %v1283_v10 = vadd.f32 %v1260_v62, %v1223_v4  ;;  %v1284_v11 = vadd.f32 %v1280_v63, %v1224_v7 }
 0x40b   : > { %v1388_v5 = vpop.f32.mrf.mxu0  ;;  %v1408_v6 = vpop.f32.mrf.mxu1 }
 0x40f   : > { %v1321_v8 = vpop.f32.mrf.mxu2  ;;  %v1341_v9 = vpop.f32.mrf.mxu3 }
 0x410   : > { %v1344_v12 = vadd.f32 %v1321_v8, %v1283_v10  ;;  %v1345_v13 = vadd.f32 %v1341_v9, %v1284_v11 }
 0x412   : > { %v1411_v14 = vadd.f32 %v1388_v5, %v1344_v12  ;;  %v1412_v15 = vadd.f32 %v1408_v6, %v1345_v13 }
 0x413   : > { %v1510_v16 = vpop.f32.mrf.mxu0  ;;  %v1530_v17 = vpop.f32.mrf.mxu1 }
 0x417   : > { %v1449_v19 = vpop.f32.mrf.mxu2  ;;  %v1469_v20 = vpop.f32.mrf.mxu3 }
 0x418   : > { %v1472_v21 = vadd.f32 %v1449_v19, %v1411_v14  ;;  %v1473_v23 = vadd.f32 %v1469_v20, %v1412_v15 }
 0x41a   : > { %v1533_v24 = vadd.f32 %v1510_v16, %v1472_v21  ;;  %v1534_v25 = vadd.f32 %v1530_v17, %v1473_v23 }
 0x41c   : > { %v1541_v28 = vadd.f32 %v1539_v27, %v1533_v24  ;;  %v1542_v29 = vadd.f32 %v1539_v27, %v1534_v25 }
 0x41e   : > { %v1544_v30 = vmax.f32 %v1542_v29, 0.0  ;;  %v1543_v31 = vmax.f32 %v1541_v28, 0.0 }
 0x420   : > { %v1547_v18 = vrot.slane %v1544_v30, 4 }
 0x422   : > { %v1548_v22 = vsel %vm463_vm1, %v1543_v31, %v1547_v18 }
 0x423   : > { %1550 = vst [vmem:[%s450_s4] sm:$0xff] %v1548_v22 }
 0x424   : > { %2062 = shalt.err (!%p2059_p10)
}
 0x425   : > { %1797 = dma.vmem_to_hbm [thread:$0]  (%p2271_p5), %s1566_s21, 128, %s1568_s11, %s1552_s20  }
 0x426 PF: > { %s1579_s17 = sand.u32 1, %s2097_s13   ;;  %p2624_p13 = scmp.ge.s32.totalorder %s2109_s16, 2 }
 0x427   : > { %s1580_s12 = scalar_lea.sflag [#allocation4], %s1579_s17 }
 0x428   : > { %p1817_p11 = pnand %p2624_p13, %p2275_p6 }
 0x42a   : > { %p1818_p0 = pneg %p1817_p11 }
 0x42c   : > { %2092 = dma.done.wait (%p1818_p0), %s1580_s12, 128  }
 0x42d   : > { %2094 = vsyncadd (%p1818_p0), %s1580_s12, 4294967168  ;;  %s2625_s30 = sld [smem:[#allocation16_spill]]  ;;  %p25_p2 = scmp.ge.s32.totalorder %s2245_s28, 4  }
 0x42e   : > { %s2626_s13 = smov %s2101_s14  ;;  %s2627_s14 = smov %s2105_s15 }
 0x42f   : > { %s2629_s16 = smov %s2245_s28  ;;  %27 = sbr.rel (!%p25_p2) target bundleno = 12 (0xc), region = 135 }
 0x433   : > { %s2628_s15 = smov %s2625_s30 }
 0x434   :  { %1586 = vsyncpa [#allocation3], 1 }
 0x435   :  { %1588 = vsyncpa [#allocation3 + $0x1], 1 }
 0x436   :  { %1589 = vsyncpa [#allocation6], 1 }
 0x437   :  { %1590 = vsyncpa [#allocation9], 1 }
 0x438   :  { %1591 = vsyncpa [#allocation4], 1 }
 0x439   :  { %1593 = vsyncpa [#allocation4 + $0x1], 1 }

</bundles_post_ra>
